<compile_context>
chip_gen: v6e
topology: v6e:2x2x1
jax: 0.10.0
libtpu: 0.0.40
codegen_flags: <defaults>
</compile_context>

<pallas_src>
import jax
import jax.numpy as jnp
from jax.experimental import pallas as pl
from jax.experimental.pallas import tpu as pltpu

_LANES = 128
_CHUNK_ROWS = 256          # rows per in-kernel accumulation chunk (128 KiB f32)


def _round_up(x, m):
    return (x + m - 1) // m * m


def _sublane_granule(dtype):
    # f32 -> 8 rows, bf16/f16 -> 16, 8-bit -> 32 (packed sublane tiling).
    return max(8, 32 // jnp.dtype(dtype).itemsize)


def _make_bce_kernel(chunk_rows, two_axis, binary_targets):
    """Kernel factory; chunk_rows / grid arity / fast-path flag are static."""

    def kernel(vrows_ref, p_ref, t_ref, o_ref, acc_ref):
        if two_axis:
            c = pl.program_id(0)              # core-split index (v7x)
            i = pl.program_id(1)              # row-block step within this core
            steps = pl.num_programs(1)
        else:
            c = 0
            i = pl.program_id(0)
            steps = pl.num_programs(0)

        @pl.when(i == 0)
        def _():
            acc_ref[...] = jnp.zeros_like(acc_ref)

        block_rows, lanes = p_ref.shape
        n_chunks = block_rows // chunk_rows
        logical_block = c * steps + i
        row0 = logical_block * block_rows
        valid_rows = vrows_ref[0]             # rows of the (padded) array

        def bce(x_raw, t_raw):
            x = x_raw.astype(jnp.float32)
            t = t_raw.astype(jnp.float32)
            p = jax.nn.sigmoid(x)
            if binary_targets:
                # Bit-exact with the two-log form when t is exactly 0 or 1.
                log_term = jnp.maximum(
                    jnp.log(jnp.where(t > 0.5, p, 1.0 - p)), jnp.float32(-100.0))
                return -log_term
            log_p = jnp.maximum(jnp.log(p), jnp.float32(-100.0))
            log_1mp = jnp.maximum(jnp.log(1.0 - p), jnp.float32(-100.0))
            return -(t * log_p + (1.0 - t) * log_1mp)

        def fold(loss):
            # Pure-VPU fold of (chunk_rows,128) into the (8,128) accumulator.
            return loss.reshape(chunk_rows // 8, 8, lanes).sum(axis=0)

        is_full = row0 + block_rows <= valid_rows     # every row of block valid
        is_real = row0 < valid_rows                   # not a phantom block

        @pl.when(is_full)
        def _():                                       # hot path: no masking
            def body(k, carry):
                r = pl.multiple_of(k * chunk_rows, chunk_rows)
                loss = bce(p_ref[pl.ds(r, chunk_rows), :],
                           t_ref[pl.ds(r, chunk_rows), :])
                acc_ref[...] += fold(loss)
                return carry
            jax.lax.fori_loop(0, n_chunks, body, 0)

        @pl.when(jnp.logical_and(is_real, jnp.logical_not(is_full)))
        def _():                                       # single ragged last block
            row_ids = jax.lax.broadcasted_iota(jnp.int32, (chunk_rows, lanes), 0)

            def body(k, carry):
                r = pl.multiple_of(k * chunk_rows, chunk_rows)
                loss = bce(p_ref[pl.ds(r, chunk_rows), :],
                           t_ref[pl.ds(r, chunk_rows), :])
                valid = (row0 + r + row_ids) < valid_rows
                acc_ref[...] += fold(jnp.where(valid, loss, jnp.float32(0.0)))
                return carry
            jax.lax.fori_loop(0, n_chunks, body, 0)

        @pl.when(i == steps - 1)
        def _():
            # Single cross-lane (XLU) reduction per core; scalar partial -> SMEM.
            o_ref[0, 0] = jnp.sum(acc_ref[...])

    return kernel


def _partial_sums(p2, t2, *, num_splits, core_parallel, max_block_rows,
                  binary_targets):
    rows, lanes = p2.shape
    granule = max(_sublane_granule(p2.dtype), _sublane_granule(t2.dtype))

    per_core = pl.cdiv(rows, num_splits)
    chunk_rows = min(_CHUNK_ROWS, _round_up(per_core, granule))
    # Largest multiple of chunk_rows that fits the per-generation cap and never
    # exceeds the array (so only the standard ragged-last-block case remains).
    block_rows = min(max_block_rows,
                     max(chunk_rows, (per_core // chunk_rows) * chunk_rows))
    n_blocks = pl.cdiv(rows, block_rows)
    steps_per_core = pl.cdiv(n_blocks, num_splits)

    vrows = jnp.asarray([rows], dtype=jnp.int32)

    if num_splits > 1:
        grid = (num_splits, steps_per_core)

        def in_map(c, i, vr):
            # Clamp phantom blocks to the last real block (DMA stays in bounds;
            # the kernel skips their accumulation entirely).
            return (jnp.minimum(c * steps_per_core + i, n_blocks - 1), 0)

        def out_map(c, i, vr):
            return (c, 0)

        dim_sem = (pltpu.CORE_PARALLEL if core_parallel else pltpu.ARBITRARY,
                   pltpu.ARBITRARY)
        two_axis = True
    else:
        grid = (n_blocks,)

        def in_map(i, vr):
            return (i, 0)

        def out_map(i, vr):
            return (0, 0)

        dim_sem = (pltpu.ARBITRARY,)
        two_axis = False

    kernel = _make_bce_kernel(chunk_rows, two_axis, binary_targets)

    return pl.pallas_call(
        kernel,
        out_shape=jax.ShapeDtypeStruct((num_splits, 1), jnp.float32),
        grid_spec=pltpu.PrefetchScalarGridSpec(
            num_scalar_prefetch=1,
            grid=grid,
            in_specs=[
                pl.BlockSpec((block_rows, lanes), in_map),
                pl.BlockSpec((block_rows, lanes), in_map),
            ],
            out_specs=pl.BlockSpec((1, 1), out_map, memory_space=pltpu.SMEM),
            scratch_shapes=[pltpu.VMEM((8, _LANES), jnp.float32)],
        ),
        compiler_params=pltpu.CompilerParams(dimension_semantics=dim_sem),
    )(vrows, p2, t2)


def bce_loss(preds, targets, *, binary_targets=False):
    """Equivalent of BCELoss.forward(preds, targets) -> scalar mean BCE."""
    assert preds.shape == targets.shape
    n_valid = preds.size
    assert n_valid > 0

    try:
        kind = jax.devices()[0].device_kind.lower()
    except Exception:
        kind = ""

    if "v7" in kind:
        # 2 TensorCores/chip; 4 MiB input blocks, 16 MiB double-buffered.
        num_splits, core_parallel, max_block_rows = 2, True, 8192
    elif "v6" in kind:
        num_splits, core_parallel, max_block_rows = 1, False, 8192
    else:
        # v5e / v5p / v4 / unknown: single core path, 8 MiB of double-buffered
        # inputs fits the 16 MiB default scoped-VMEM limit.
        num_splits, core_parallel, max_block_rows = 1, False, 4096

    granule = max(_sublane_granule(preds.dtype), _sublane_granule(targets.dtype))
    p_flat = preds.reshape(-1)
    t_flat = targets.reshape(-1)

    padded = _round_up(n_valid, granule * _LANES)
    pad = padded - n_valid
    if pad:
        # Zero-loss padding: sigmoid(+100) == 1 and target == 1 give exactly
        # 0 loss in f32, so padded elements need no in-kernel masking.
        p_flat = jnp.pad(p_flat, (0, pad), constant_values=100.0)
        t_flat = jnp.pad(t_flat, (0, pad), constant_values=1.0)

    rows = padded // _LANES
    p2 = p_flat.reshape(rows, _LANES)     # free row-major reshape, lanes last
    t2 = t_flat.reshape(rows, _LANES)

    def run(ns, cp):
        return _partial_sums(p2, t2, num_splits=ns, core_parallel=cp,
                             max_block_rows=max_block_rows,
                             binary_targets=binary_targets)

    try:
        partials = run(num_splits, core_parallel)
    except Exception:
        if num_splits == 1:
            raise
        # Fall back to the single-core grid if the 2-TC core-parallel split is
        # not supported by this chip / runtime.
        partials = run(1, False)

    return jnp.sum(partials) / jnp.float32(n_valid)


def _reference(preds, targets):
    p = jax.nn.sigmoid(preds.astype(jnp.float32)).reshape(-1)
    t = targets.astype(jnp.float32).reshape(-1)
    return -jnp.mean(
        t * jnp.maximum(jnp.log(p), -100.0)
        + (1.0 - t) * jnp.maximum(jnp.log(1.0 - p), -100.0))


if __name__ == "__main__":
    key = jax.random.PRNGKey(0)
    k1, k2, k3, k4 = jax.random.split(key, 4)

    # Primary case: segmentation-style logits/targets (NCHW), multiple of 1024.
    preds = jax.random.normal(k1, (2, 4, 16, 16), dtype=jnp.float32)
    targets = (jax.random.uniform(k2, (2, 4, 16, 16)) > 0.5).astype(jnp.float32)

    loss = bce_loss(preds, targets)
    jax.block_until_ready(loss)
    ref = _reference(preds, targets)
    assert jnp.allclose(loss, ref, rtol=1e-5, atol=1e-6), (loss, ref)

    # Ragged case: exercises zero-loss tail padding and the masked last block.
    preds2 = jax.random.normal(k3, (4, 4, 46, 46), dtype=jnp.float32)
    targets2 = (jax.random.uniform(k4, (4, 4, 46, 46)) > 0.5).astype(jnp.float32)

    loss2 = bce_loss(preds2, targets2)
    jax.block_until_ready(loss2)
    ref2 = _reference(preds2, targets2)
    assert jnp.allclose(loss2, ref2, rtol=1e-5, atol=1e-6), (loss2, ref2)

    print("KERNEL_OK")
</pallas_src>

<mosaic_0001>
module attributes {stable_mosaic.version = 11 : i64} {
  func.func @kernel(%arg0: i32, %arg1: memref<1xi32, #tpu.memory_space<smem>>, %arg2: memref<16x128xf32, #tpu.memory_space<vmem>>, %arg3: memref<16x128xf32, #tpu.memory_space<vmem>>, %arg4: memref<1x1xf32, #tpu.memory_space<smem>>, %arg5: memref<8x128xf32, #tpu.memory_space<vmem>>) attributes {dimension_semantics = [#tpu.dimension_semantics<arbitrary>], iteration_bounds = array<i64: 1>, scalar_prefetch = 1 : i64, scratch_operands = 1 : i64, tpu.core_type = #tpu.core_type<tc>, window_params = [{transform_indices = @transform_0, window_bounds = array<i64: 16, 128>}, {transform_indices = @transform_1, window_bounds = array<i64: 16, 128>}, {transform_indices = @transform_2, window_bounds = array<i64: 1, 1>}]} {
    %c0_i32 = arith.constant 0 : i32
    %0 = arith.cmpi eq, %arg0, %c0_i32 : i32
    %1 = arith.extui %0 : i1 to i32
    %c0_i32_0 = arith.constant 0 : i32
    %2 = arith.cmpi ne, %1, %c0_i32_0 : i32
    scf.if %2 {
      %cst = arith.constant 0.000000e+00 : f32
      %18 = vector.broadcast %cst : f32 to vector<8x128xf32>
      %c0_7 = arith.constant 0 : index
      %c0_8 = arith.constant 0 : index
      %19 = vector.load %arg5[%c0_7, %c0_8] : memref<8x128xf32, #tpu.memory_space<vmem>>, vector<8x128xf32>
      tpu.vector_store %arg5[%c0_7, %c0_8], %18 {strides = array<i32>} : memref<8x128xf32, #tpu.memory_space<vmem>>, vector<8x128xf32>,
    } else {
    }
    %c0_i32_1 = arith.constant 0 : i32
    %3 = arith.addi %c0_i32_1, %arg0 : i32
    %c16_i32 = arith.constant 16 : i32
    %4 = arith.muli %3, %c16_i32 : i32
    %c0 = arith.constant 0 : index
    %5 = memref.load %arg1[%c0] : memref<1xi32, #tpu.memory_space<smem>>
    %c16_i32_2 = arith.constant 16 : i32
    %6 = arith.addi %4, %c16_i32_2 : i32
    %7 = arith.cmpi sle, %6, %5 : i32
    %8 = arith.cmpi slt, %4, %5 : i32
    %9 = arith.extui %7 : i1 to i32
    %c0_i32_3 = arith.constant 0 : i32
    %10 = arith.cmpi ne, %9, %c0_i32_3 : i32
    scf.if %10 {
      %c0_i32_7 = arith.constant 0 : i32
      %c16_i32_8 = arith.constant 16 : i32
      %18 = arith.muli %c0_i32_7, %c16_i32_8 : i32
      %19 = tpu.assume_multiple %18, 16 : i32
      %20 = arith.index_cast %19 : i32 to index
      %c0_9 = arith.constant 0 : index
      %21 = vector.load %arg2[%20, %c0_9] : memref<16x128xf32, #tpu.memory_space<vmem>>, vector<16x128xf32>
      %22 = arith.index_cast %19 : i32 to index
      %c0_10 = arith.constant 0 : index
      %23 = vector.load %arg3[%22, %c0_10] : memref<16x128xf32, #tpu.memory_space<vmem>>, vector<16x128xf32>
      %24 = arith.negf %21 : vector<16x128xf32>
      %25 = math.exp %24 : vector<16x128xf32>
      %cst = arith.constant 1.000000e+00 : f32
      %26 = vector.broadcast %cst : f32 to vector<16x128xf32>
      %27 = arith.addf %26, %25 : vector<16x128xf32>
      %28 = arith.divf %26, %27 : vector<16x128xf32>
      %29 = math.log %28 : vector<16x128xf32>
      %cst_11 = arith.constant -1.000000e+02 : f32
      %30 = vector.broadcast %cst_11 : f32 to vector<16x128xf32>
      %31 = arith.maximumf %29, %30 : vector<16x128xf32>
      %cst_12 = arith.constant 1.000000e+00 : f32
      %32 = vector.broadcast %cst_12 : f32 to vector<16x128xf32>
      %33 = arith.subf %32, %28 : vector<16x128xf32>
      %34 = math.log %33 : vector<16x128xf32>
      %cst_13 = arith.constant -1.000000e+02 : f32
      %35 = vector.broadcast %cst_13 : f32 to vector<16x128xf32>
      %36 = arith.maximumf %34, %35 : vector<16x128xf32>
      %37 = arith.mulf %23, %31 : vector<16x128xf32>
      %cst_14 = arith.constant 1.000000e+00 : f32
      %38 = vector.broadcast %cst_14 : f32 to vector<16x128xf32>
      %39 = arith.subf %38, %23 : vector<16x128xf32>
      %40 = arith.mulf %39, %36 : vector<16x128xf32>
      %41 = arith.addf %37, %40 : vector<16x128xf32>
      %cst_15 = arith.constant 0.000000e+00 : f32
      %42 = vector.broadcast %cst_15 : f32 to vector<16x128xf32>
      %43 = arith.subf %42, %41 : vector<16x128xf32>
      %c0_16 = arith.constant 0 : index
      %c0_17 = arith.constant 0 : index
      %44 = vector.load %arg5[%c0_16, %c0_17] : memref<8x128xf32, #tpu.memory_space<vmem>>, vector<8x128xf32>
      %45 = vector.shape_cast %43 : vector<16x128xf32> to vector<2x8x128xf32>
      %cst_18 = arith.constant dense<0.000000e+00> : vector<8x128xf32>
      %46 = vector.multi_reduction <add>, %45, %cst_18 [0] : vector<2x8x128xf32> to vector<8x128xf32>
      %47 = arith.addf %44, %46 : vector<8x128xf32>
      %c0_19 = arith.constant 0 : index
      %c0_20 = arith.constant 0 : index
      %48 = vector.load %arg5[%c0_19, %c0_20] : memref<8x128xf32, #tpu.memory_space<vmem>>, vector<8x128xf32>
      tpu.vector_store %arg5[%c0_19, %c0_20], %47 {strides = array<i32>} : memref<8x128xf32, #tpu.memory_space<vmem>>, vector<8x128xf32>,
      %c1_i32 = arith.constant 1 : i32
    } else {
    }
    %true = arith.constant true
    %11 = arith.xori %7, %true : i1
    %12 = arith.andi %8, %11 : i1
    %13 = arith.extui %12 : i1 to i32
    %c0_i32_4 = arith.constant 0 : i32
    %14 = arith.cmpi ne, %13, %c0_i32_4 : i32
    scf.if %14 {
      %18 = tpu.iota {dimensions = array<i32: 0>} : vector<16x128xi32>
      %c0_i32_7 = arith.constant 0 : i32
      %c16_i32_8 = arith.constant 16 : i32
      %19 = arith.muli %c0_i32_7, %c16_i32_8 : i32
      %20 = tpu.assume_multiple %19, 16 : i32
      %21 = arith.index_cast %20 : i32 to index
      %c0_9 = arith.constant 0 : index
      %22 = vector.load %arg2[%21, %c0_9] : memref<16x128xf32, #tpu.memory_space<vmem>>, vector<16x128xf32>
      %23 = arith.index_cast %20 : i32 to index
      %c0_10 = arith.constant 0 : index
      %24 = vector.load %arg3[%23, %c0_10] : memref<16x128xf32, #tpu.memory_space<vmem>>, vector<16x128xf32>
      %25 = arith.negf %22 : vector<16x128xf32>
      %26 = math.exp %25 : vector<16x128xf32>
      %cst = arith.constant 1.000000e+00 : f32
      %27 = vector.broadcast %cst : f32 to vector<16x128xf32>
      %28 = arith.addf %27, %26 : vector<16x128xf32>
      %29 = arith.divf %27, %28 : vector<16x128xf32>
      %30 = math.log %29 : vector<16x128xf32>
      %cst_11 = arith.constant -1.000000e+02 : f32
      %31 = vector.broadcast %cst_11 : f32 to vector<16x128xf32>
      %32 = arith.maximumf %30, %31 : vector<16x128xf32>
      %cst_12 = arith.constant 1.000000e+00 : f32
      %33 = vector.broadcast %cst_12 : f32 to vector<16x128xf32>
      %34 = arith.subf %33, %29 : vector<16x128xf32>
      %35 = math.log %34 : vector<16x128xf32>
      %cst_13 = arith.constant -1.000000e+02 : f32
      %36 = vector.broadcast %cst_13 : f32 to vector<16x128xf32>
      %37 = arith.maximumf %35, %36 : vector<16x128xf32>
      %38 = arith.mulf %24, %32 : vector<16x128xf32>
      %cst_14 = arith.constant 1.000000e+00 : f32
      %39 = vector.broadcast %cst_14 : f32 to vector<16x128xf32>
      %40 = arith.subf %39, %24 : vector<16x128xf32>
      %41 = arith.mulf %40, %37 : vector<16x128xf32>
      %42 = arith.addf %38, %41 : vector<16x128xf32>
      %cst_15 = arith.constant 0.000000e+00 : f32
      %43 = vector.broadcast %cst_15 : f32 to vector<16x128xf32>
      %44 = arith.subf %43, %42 : vector<16x128xf32>
      %45 = arith.addi %4, %20 : i32
      %46 = vector.broadcast %45 : i32 to vector<16x128xi32>
      %47 = arith.addi %46, %18 : vector<16x128xi32>
      %48 = vector.broadcast %5 : i32 to vector<16x128xi32>
      %49 = arith.cmpi slt, %47, %48 : vector<16x128xi32>
      %c0_16 = arith.constant 0 : index
      %c0_17 = arith.constant 0 : index
      %50 = vector.load %arg5[%c0_16, %c0_17] : memref<8x128xf32, #tpu.memory_space<vmem>>, vector<8x128xf32>
      %cst_18 = arith.constant 0.000000e+00 : f32
      %51 = vector.broadcast %cst_18 : f32 to vector<16x128xf32>
      %52 = arith.select %49, %44, %51 : vector<16x128xi1>, vector<16x128xf32>
      %53 = vector.shape_cast %52 : vector<16x128xf32> to vector<2x8x128xf32>
      %cst_19 = arith.constant dense<0.000000e+00> : vector<8x128xf32>
      %54 = vector.multi_reduction <add>, %53, %cst_19 [0] : vector<2x8x128xf32> to vector<8x128xf32>
      %55 = arith.addf %50, %54 : vector<8x128xf32>
      %c0_20 = arith.constant 0 : index
      %c0_21 = arith.constant 0 : index
      %56 = vector.load %arg5[%c0_20, %c0_21] : memref<8x128xf32, #tpu.memory_space<vmem>>, vector<8x128xf32>
      tpu.vector_store %arg5[%c0_20, %c0_21], %55 {strides = array<i32>} : memref<8x128xf32, #tpu.memory_space<vmem>>, vector<8x128xf32>,
      %c1_i32 = arith.constant 1 : i32
    } else {
    }
    %c0_i32_5 = arith.constant 0 : i32
    %15 = arith.cmpi eq, %arg0, %c0_i32_5 : i32
    %16 = arith.extui %15 : i1 to i32
    %c0_i32_6 = arith.constant 0 : i32
    %17 = arith.cmpi ne, %16, %c0_i32_6 : i32
    scf.if %17 {
      %c0_7 = arith.constant 0 : index
      %c0_8 = arith.constant 0 : index
      %18 = vector.load %arg5[%c0_7, %c0_8] : memref<8x128xf32, #tpu.memory_space<vmem>>, vector<8x128xf32>
      %19 = vector.shape_cast %18 : vector<8x128xf32> to vector<1x8x128xf32>
      %cst = arith.constant dense<0.000000e+00> : vector<1xf32>
      %20 = vector.multi_reduction <add>, %19, %cst [1, 2] : vector<1x8x128xf32> to vector<1xf32>
      %21 = vector.shape_cast %20 : vector<1xf32> to vector<1x1x1xf32>
      %22 = vector.extract %21[0, 0, 0] : f32 from vector<1x1x1xf32>
      %c0_9 = arith.constant 0 : index
      %c0_10 = arith.constant 0 : index
      %23 = memref.load %arg4[%c0_9, %c0_10] : memref<1x1xf32, #tpu.memory_space<smem>>
      memref.store %22, %arg4[%c0_9, %c0_10] : memref<1x1xf32, #tpu.memory_space<smem>>
    } else {
    }
    return
  }
  func.func @transform_0(%arg0: i32, %arg1: memref<1xi32, #tpu.memory_space<smem>>) -> (i32, i32) {
    %c0_i32 = arith.constant 0 : i32
    %c0_i32_0 = arith.constant 0 : i32
    return %arg0, %c0_i32 : i32, i32
  }
  func.func @transform_1(%arg0: i32, %arg1: memref<1xi32, #tpu.memory_space<smem>>) -> (i32, i32) {
    %c0_i32 = arith.constant 0 : i32
    %c0_i32_0 = arith.constant 0 : i32
    return %arg0, %c0_i32 : i32, i32
  }
  func.func @transform_2(%arg0: i32, %arg1: memref<1xi32, #tpu.memory_space<smem>>) -> (i32, i32) {
    %c0_i32 = arith.constant 0 : i32
    %c0_i32_0 = arith.constant 0 : i32
    %c0_i32_1 = arith.constant 0 : i32
    return %c0_i32, %c0_i32_0 : i32, i32
  }
}

</mosaic_0001>

<bundles_post_ra>
// kernel: tpu_custom_call.1
= control target key start
LH: loop header
LB: loop body
LE: loop exit
PB: predicated region body
PF: predicated region fallthrough
CT: control target
= control target key end

     0   :  { %9 = vsyncpa [#allocation6], 0  ;;  %s348_s0 = inlined_call_operand.<no memory space> [shape: s32[1], index: 0, kind: input, shape index: {}]   ;;  %s349_s1 = inlined_call_operand.hbm [shape: f32[16,128], index: 1, kind: input, shape index: {}]   ;;  %s350_s2 = inlined_call_operand.hbm [shape: f32[16,128], index: 2, kind: input, shape index: {}]   ;;  %s351_s3 = inlined_call_operand.hbm [shape: f32[1,1], index: 3, kind: output, shape index: {}]  }
   0x1   :  { %10 = vsyncpa [#allocation9], 0 }
   0x2   :  { %11 = vsyncpa [#allocation7], 0  ;;  %s292_s12 = smov [#allocation5]  }
   0x3   :  { %s17_s13 = sshll.u32 %s292_s12, 4  ;;  %s18_s13 = int_to_ptr.vmem [resolvable:$true] %s17_s13 }
   0x4   :  { %s246_s14 = scalar_lea.vmem %s18_s13, 256  ;;  %p251_p1 = scmp.lt.s32.totalorder %s18_s13, %s18_s13 }
   0x5   :  { %p247_p0 = scmp.ne.s32.totalorder %s18_s13, %s246_s14  ;;  %p252_p2 = scmp.lt.s32.totalorder %s246_s14, %s246_s14 }
   0x7   :  { %p253_p3 = por %p252_p2, %p251_p1 }
   0x9   :  { %p254_p4 = pnand %p253_p3, %p247_p0 }
   0xb   :  { %257 = shalt.err (!%p254_p4)
}
   0xc   :  { %s293_s15 = smov 128   ;;  %s294_s16 = smov 8  }
   0xd   :  { %23 = dma.hbm_to_vmem [thread:$0]  %s349_s1, 256, %s18_s13, [#allocation6], %s293_s15, %s293_s15, %s294_s16  }
   0xe   :  { %s295_s19 = smov [#allocation8]  }
   0xf   :  { %s29_s20 = sshll.u32 %s295_s19, 4  ;;  %s30_s20 = int_to_ptr.vmem [resolvable:$true] %s29_s20 }
  0x10   :  { %s266_s21 = scalar_lea.vmem %s30_s20, 256  ;;  %p271_p6 = scmp.lt.s32.totalorder %s30_s20, %s30_s20 }
  0x11   :  { %p267_p5 = scmp.ne.s32.totalorder %s30_s20, %s266_s21  ;;  %p272_p7 = scmp.lt.s32.totalorder %s266_s21, %s266_s21 }
  0x13   :  { %p273_p8 = por %p272_p7, %p271_p6 }
  0x15   :  { %p274_p9 = pnand %p273_p8, %p267_p5 }
  0x17   :  { %277 = shalt.err (!%p274_p9)
}
  0x18   :  { %35 = dma.hbm_to_vmem [thread:$0]  %s350_s2, 256, %s30_s20, [#allocation9], %s293_s15, %s293_s15, %s294_s16  }
  0x19   :  { %286 = dma.done.wait [#allocation6], 256  }
  0x1a   :  { %287 = vsyncadd [#allocation6], 4294967040 }
  0x1b   :  { %288 = dma.done.wait [#allocation9], 256  }
  0x1c   :  { %289 = vsyncadd [#allocation9], 4294967040  ;;  %p191_p10 = scmp.gt.s32.totalorder %s348_s0, 0  ;;  %v296_v0 = vmov 0.0   ;;  %p192_p11 = scmp.lt.s32.totalorder %s348_s0, 16 }
  0x1d   :  { %46 = vst [vmem:[#allocation2] sm:$0xff] %v296_v0 }
  0x1e   :  { %54 = sbr.rel (%p192_p11) target bundleno = 100 (0x64), region = 25 }
  0x23   :  { %v55_v1 = vld [vmem:[#allocation5] sm:$0xff]  ;;  %v56_v2 = vld [vmem:[#allocation5 + $0x8] sm:$0xff]  ;;  %v57_v14 = vld [vmem:[#allocation8] sm:$0xff] }
  0x24   :  { %v193_v3 = vmul.f32 -1.442695, %v55_v1  ;;  %v194_v4 = vmul.f32 -1.442695, %v56_v2  ;;  %v58_v16 = vld [vmem:[#allocation8 + $0x8] sm:$0xff]  ;;  %v87_v23 = vsub.f32 1.0, %v57_v14 }
  0x25   :  { %v88_v26 = vsub.f32 1.0, %v58_v16  ;;  %v95_v37 = vld [vmem:[#allocation2] sm:$0xff] }
  0x26   :  { %206 = vpow2.f32 %v193_v3 }
  0x27   :  { %208 = vpow2.f32 %v194_v4 }
  0x33   :  { %v207_v5 = vpop.eup %206 }
  0x34   :  { %v209_v6 = vpop.eup %208  ;;  %v65_v7 = vadd.f32 1.0, %v207_v5 }
  0x35   :  { %v66_v8 = vadd.f32 1.0, %v209_v6 }
  0x36   :  { %210 = vrcp.f32 %v65_v7 }
  0x37   :  { %212 = vrcp.f32 %v66_v8 }
  0x43   :  { %v211_v9 = vpop.eup %210 }
  0x44   :  { %v213_v10 = vpop.eup %212  ;;  %214 = vlog2.f32 %v211_v9  ;;  %v77_v11 = vsub.f32 1.0, %v211_v9 }
  0x45   :  { %216 = vlog2.f32 %v213_v10  ;;  %v78_v12 = vsub.f32 1.0, %v213_v10 }
  0x46   :  { %218 = vlog2.f32 %v77_v11 }
  0x47   :  { %220 = vlog2.f32 %v78_v12 }
  0x51   :  { %v215_v13 = vpop.eup %214 }
  0x52   :  { %v217_v15 = vpop.eup %216  ;;  %v72_v17 = vmul.f32 0.6931472, %v215_v13 }
  0x53   :  { %v219_v18 = vpop.eup %218  ;;  %v74_v19 = vmul.f32 0.6931472, %v217_v15 }
  0x54   :  { %v221_v20 = vpop.eup %220  ;;  %v75_v21 = vmax.f32 %v72_v17, -100.0  ;;  %v80_v22 = vmul.f32 0.6931472, %v219_v18 }
  0x55   :  { %v76_v24 = vmax.f32 %v74_v19, -100.0  ;;  %v82_v25 = vmul.f32 0.6931472, %v221_v20 }
  0x56   :  { %v83_v27 = vmax.f32 %v80_v22, -100.0  ;;  %v85_v28 = vmul.f32 %v75_v21, %v57_v14 }
  0x57   :  { %v84_v29 = vmax.f32 %v82_v25, -100.0  ;;  %v86_v30 = vmul.f32 %v76_v24, %v58_v16 }
  0x58   :  { %v89_v31 = vmul.f32 %v87_v23, %v83_v27 }
  0x59   :  { %v90_v32 = vmul.f32 %v88_v26, %v84_v29 }
  0x5a   :  { %v91_v33 = vadd.f32 %v89_v31, %v85_v28 }
  0x5b   :  { %v92_v34 = vadd.f32 %v90_v32, %v86_v30 }
  0x5c   :  { %v93_v35 = vsub.f32 0.0, %v91_v33 }
  0x5d   :  { %v94_v36 = vsub.f32 0.0, %v92_v34 }
  0x5f   :  { %v96_v38 = vadd.f32 %v94_v36, %v93_v35 }
  0x61   :  { %v97_v39 = vadd.f32 %v96_v38, %v95_v37 }
  0x63   :  { %98 = vst [vmem:[#allocation2] sm:$0xff] %v97_v39 }
  0x64 PF:  { %p100_p12 = pnand %p192_p11, %p191_p10 }
  0x66   :  { %103 = sbr.rel (%p100_p12) target bundleno = 173 (0xad), region = 29 }
  0x6b   :  { %v107_v40 = vld [vmem:[#allocation5] sm:$0xff]  ;;  %v108_v41 = vld [vmem:[#allocation5 + $0x8] sm:$0xff]  ;;  %v104_v52 = vlaneseq  ;;  %v109_v54 = vld [vmem:[#allocation8] sm:$0xff]  ;;  %v151_v10 = vstv %s348_s0 }
  0x6c   :  { %v196_v42 = vmul.f32 -1.442695, %v107_v40  ;;  %v197_v43 = vmul.f32 -1.442695, %v108_v41  ;;  %v110_v56 = vld [vmem:[#allocation8 + $0x8] sm:$0xff]  ;;  %v139_v0 = vsub.f32 1.0, %v109_v54 }
  0x6d   :  { %v105_v61 = vshrl.u32 %v104_v52, 7  ;;  %v140_v3 = vsub.f32 1.0, %v110_v56  ;;  %v154_v17 = vld [vmem:[#allocation2] sm:$0xff] }
  0x6e   :  { %222 = vpow2.f32 %v196_v42 }
  0x6f   :  { %224 = vpow2.f32 %v197_v43  ;;  %v106_v8 = vadd.s32 8, %v105_v61  ;;  %vm152_vm0 = vcmp.lt.s32.totalorder %v105_v61, %v151_v10 }
  0x71   :  { %vm153_vm1 = vcmp.lt.s32.totalorder %v106_v8, %v151_v10 }
  0x7b   :  { %v223_v44 = vpop.eup %222 }
  0x7c   :  { %v225_v45 = vpop.eup %224  ;;  %v117_v46 = vadd.f32 1.0, %v223_v44 }
  0x7d   :  { %v118_v47 = vadd.f32 1.0, %v225_v45 }
  0x7e   :  { %226 = vrcp.f32 %v117_v46 }
  0x7f   :  { %228 = vrcp.f32 %v118_v47 }
  0x8b   :  { %v227_v48 = vpop.eup %226 }
  0x8c   :  { %v229_v49 = vpop.eup %228  ;;  %230 = vlog2.f32 %v227_v48  ;;  %v129_v50 = vsub.f32 1.0, %v227_v48 }
  0x8d   :  { %232 = vlog2.f32 %v229_v49  ;;  %v130_v51 = vsub.f32 1.0, %v229_v49 }
  0x8e   :  { %234 = vlog2.f32 %v129_v50 }
  0x8f   :  { %236 = vlog2.f32 %v130_v51 }
  0x99   :  { %v231_v53 = vpop.eup %230 }
  0x9a   :  { %v233_v55 = vpop.eup %232  ;;  %v124_v57 = vmul.f32 0.6931472, %v231_v53 }
  0x9b   :  { %v235_v58 = vpop.eup %234  ;;  %v126_v59 = vmul.f32 0.6931472, %v233_v55 }
  0x9c   :  { %v237_v60 = vpop.eup %236  ;;  %v127_v62 = vmax.f32 %v124_v57, -100.0  ;;  %v132_v63 = vmul.f32 0.6931472, %v235_v58 }
  0x9d   :  { %v128_v1 = vmax.f32 %v126_v59, -100.0  ;;  %v134_v2 = vmul.f32 0.6931472, %v237_v60 }
  0x9e   :  { %v135_v4 = vmax.f32 %v132_v63, -100.0  ;;  %v137_v5 = vmul.f32 %v127_v62, %v109_v54 }
  0x9f   :  { %v136_v6 = vmax.f32 %v134_v2, -100.0  ;;  %v138_v7 = vmul.f32 %v128_v1, %v110_v56 }
  0xa0   :  { %v141_v9 = vmul.f32 %v139_v0, %v135_v4 }
  0xa1   :  { %v142_v11 = vmul.f32 %v140_v3, %v136_v6 }
  0xa2   :  { %v143_v12 = vadd.f32 %v141_v9, %v137_v5 }
  0xa3   :  { %v144_v13 = vadd.f32 %v142_v11, %v138_v7 }
  0xa4   :  { %v145_v14 = vsub.f32 0.0, %v143_v12 }
  0xa5   :  { %v146_v15 = vsub.f32 0.0, %v144_v13 }
  0xa6   :  { %v155_v16 = vsel %vm152_vm0, %v145_v14, 0.0 }
  0xa7   :  { %v156_v18 = vsel %vm153_vm1, %v146_v15, 0.0 }
  0xa8   :  { %v157_v19 = vadd.f32 %v156_v18, %v155_v16 }
  0xaa   :  { %v158_v20 = vadd.f32 %v157_v19, %v154_v17 }
  0xac   :  { %159 = vst [vmem:[#allocation2] sm:$0xff] %v158_v20 }
  0xad PF:  { %s297_s7 = smov [#allocation10]  }
  0xb3   :  { %v163_v21 = vld [vmem:[#allocation2] sm:$0xff] }
  0xb4   :  { %164 = vadd.xlane.f32.xlu0 %v163_v21 }
 0x13d   :  { %v165_v22 = vpop.xlane.xlu0 %164 }
 0x13e   :  { %v166_v23 = vrot.slane %v165_v22, 4 }
 0x140   :  { %v167_v24 = vadd.f32 %v166_v23, %v165_v22 }
 0x142   :  { %v168_v25 = vrot.slane %v167_v24, 2 }
 0x144   :  { %v169_v26 = vadd.f32 %v168_v25, %v167_v24 }
 0x146   :  { %v170_v27 = vrot.slane %v169_v26, 1 }
 0x148   :  { %v171_v28 = vadd.f32 %v170_v27, %v169_v26 }
 0x14a   :  { %198 = vpush %v171_v28 }
 0x17b   :  { %s199_s0 = spop %198 }
 0x17c   :  { %174 = sst [smem:[#allocation10]] %s199_s0 }
 0x17d   :  { %182 = dma.smem_to_hbm %s297_s7, 16, %s351_s3, [#allocation7]  }
 0x17e   :  { %290 = dma.done.wait [#allocation7], 16  }
 0x17f   :  { %291 = vsyncadd [#allocation7], 4294967280 }
 0x180   :  { %186 = sfence }
 0x181   :  { %187 = vsyncpa [#allocation6], 1 }
 0x182   :  { %188 = vsyncpa [#allocation9], 1 }
 0x183   :  { %189 = vsyncpa [#allocation7], 1 }

</bundles_post_ra>
